<compile_context>
chip_gen: v5e
topology: v5e:2x2
jax: 0.10.0
libtpu: 0.0.40
codegen_flags: <defaults>
</compile_context>

<pallas_src>
import functools
import math

import jax
import jax.numpy as jnp
from jax.experimental import pallas as pl
from jax.experimental.pallas import tpu as pltpu


def _round_up(x, m):
    return (x + m - 1) // m * m


def _matmul_bias_kernel(a_ref, b_ref, bias_ref, o_ref, acc_ref, *, apply_relu):
    k = pl.program_id(2)

    @pl.when(k == 0)
    def _():
        acc_ref[...] = jnp.zeros_like(acc_ref)

    # Operands arrive in their storage dtype (f32 for the feature transform,
    # bf16 for the adjacency aggregation) -> native MXU matmul, f32 accumulate.
    acc_ref[...] += jnp.dot(a_ref[...], b_ref[...],
                            preferred_element_type=jnp.float32)

    @pl.when(k == pl.num_programs(2) - 1)
    def _():
        out = acc_ref[...] + bias_ref[...].astype(jnp.float32)
        if apply_relu:
            out = jnp.maximum(out, 0.0)
        o_ref[...] = out.astype(o_ref.dtype)


@functools.partial(
    jax.jit, static_argnames=("apply_relu", "out_dtype", "tm", "tn", "tk"))
def matmul_bias(a, b, bias, *, apply_relu=False, out_dtype=jnp.float32,
                tm=512, tn=512, tk=512):
    """`a @ b + bias` (optionally ReLU'd) with a tiled Pallas TPU kernel.

    a: [M, K], b: [K, N] (same dtype as a), bias: [1, N] f32 -> [M, N] out_dtype.
    """
    m, k_dim = a.shape
    k2, n = b.shape
    assert k_dim == k2
    assert bias.shape == (1, n)

    # Cap tiles at the (128-rounded) extents, then zero-pad every operand up to
    # a whole number of tiles.  For 128-aligned shapes the pads are no-ops; for
    # ragged shapes this keeps the kernel correct without in-kernel masking.
    tm = min(tm, _round_up(m, 128))
    tn = min(tn, _round_up(n, 128))
    tk = min(tk, _round_up(k_dim, 128))
    m_p = _round_up(m, tm)
    n_p = _round_up(n, tn)
    k_p = _round_up(k_dim, tk)
    if (m_p, k_p) != (m, k_dim):
        a = jnp.pad(a, ((0, m_p - m), (0, k_p - k_dim)))
    if (k_p, n_p) != (k_dim, n):
        b = jnp.pad(b, ((0, k_p - k_dim), (0, n_p - n)))
    if n_p != n:
        bias = jnp.pad(bias, ((0, 0), (0, n_p - n)))

    grid = (m_p // tm, n_p // tn, k_p // tk)
    cost = pl.CostEstimate(
        flops=2 * m_p * n_p * k_p,
        transcendentals=0,
        bytes_accessed=(a.size * a.dtype.itemsize
                        + b.size * b.dtype.itemsize
                        + bias.size * bias.dtype.itemsize
                        + m_p * n_p * jnp.dtype(out_dtype).itemsize),
    )

    kernel = functools.partial(_matmul_bias_kernel, apply_relu=apply_relu)
    out = pl.pallas_call(
        kernel,
        out_shape=jax.ShapeDtypeStruct((m_p, n_p), out_dtype),
        grid_spec=pltpu.PrefetchScalarGridSpec(
            num_scalar_prefetch=0,
            grid=grid,
            in_specs=[
                pl.BlockSpec((tm, tk), lambda i, j, k: (i, k)),   # lhs tile
                pl.BlockSpec((tk, tn), lambda i, j, k: (k, j)),   # rhs tile
                pl.BlockSpec((1, tn), lambda i, j, k: (0, j)),    # bias row
            ],
            out_specs=pl.BlockSpec((tm, tn), lambda i, j, k: (i, j)),
            scratch_shapes=[pltpu.VMEM((tm, tn), jnp.float32)],   # f32 accumulator
        ),
        compiler_params=pltpu.CompilerParams(
            dimension_semantics=("parallel", "parallel", "arbitrary")),
        cost_estimate=cost,
    )(a, b, bias)

    if (m_p, n_p) != (m, n):
        out = out[:m, :n]
    return out


def _glorot(key, shape):
    fan_in, fan_out = shape
    limit = math.sqrt(6.0 / (fan_in + fan_out))
    return jax.random.uniform(key, shape, jnp.float32, -limit, limit)


class GCN:
    """JAX/Pallas equivalent of the PyTorch GCN (stack of l_GCN layers)."""

    def __init__(self, key, adj, in_channels, hidden_channels, out_channels,
                 num_layers, dropout):
        # Symmetric GCN normalization precomputed once (hoisted out of the
        # kernels): adj_norm = D^{-1/2} A D^{-1/2}.  Isolated nodes get 0
        # instead of the inf/NaN the raw pow(-0.5) would produce.
        deg = adj.sum(axis=1)
        deg_inv_sqrt = jnp.where(deg > 0, jax.lax.rsqrt(deg), 0.0)
        adj_norm = deg_inv_sqrt[:, None] * adj * deg_inv_sqrt[None, :]
        # Dominant HBM stream stored in bf16 (halves adjacency traffic); the
        # aggregation matmul runs natively in bf16 with an f32 accumulator.
        self.adj = adj_norm.astype(jnp.bfloat16)

        layer_dims = [(in_channels, hidden_channels)]
        layer_dims += [(hidden_channels, hidden_channels)] * (num_layers - 2)
        layer_dims += [(hidden_channels, out_channels)]
        keys = jax.random.split(key, len(layer_dims))
        self.weights = [_glorot(k, d) for k, d in zip(keys, layer_dims)]
        self.biases = [jnp.zeros((1, d[1]), jnp.float32) for d in layer_dims]
        self.dropout = dropout
        # TODO(synk): training-mode dropout not implemented (inference forward).

    def __call__(self, x):
        n_layers = len(self.weights)
        for idx, (w, b) in enumerate(zip(self.weights, self.biases)):
            is_last = idx == n_layers - 1
            zero_bias = jnp.zeros((1, w.shape[1]), jnp.float32)
            # adj_norm @ (x @ W) + b  ==  (adj_norm @ x) @ W + b; doing x @ W
            # first minimizes FLOPs.  The transform writes bf16 directly so the
            # aggregation streams half-width operands.
            t = matmul_bias(x, w, zero_bias, apply_relu=False,
                            out_dtype=jnp.bfloat16)
            # Aggregation: bf16 x bf16 MXU, f32 accumulate, fused bias (+ReLU).
            x = matmul_bias(self.adj, t, b, apply_relu=not is_last,
                            out_dtype=jnp.float32, tm=1024, tn=512, tk=1024)
            # dropout: identity in eval mode
        return x


if __name__ == "__main__":
    key = jax.random.PRNGKey(0)
    k_edges, k_feat, k_params = jax.random.split(key, 3)

    # Small synthetic graph standing in for ogbn-proteins.
    num_nodes = 256
    in_channels = 128
    hidden_channels = 128
    out_channels = 64          # intentionally not 128-aligned: exercises padding
    num_layers = 3
    num_edges = 2048

    edge_index = jax.random.randint(
        k_edges, (2, num_edges), minval=0, maxval=num_nodes, dtype=jnp.int32)
    row, col = edge_index[0], edge_index[1]
    adj = jnp.zeros((num_nodes, num_nodes), jnp.float32).at[row, col].set(1.0)

    x = jax.random.normal(k_feat, (num_nodes, in_channels), dtype=jnp.float32)

    model = GCN(k_params, adj, in_channels, hidden_channels, out_channels,
                num_layers, dropout=0.5)
    out = model(x)
    jax.block_until_ready(out)

    # Plain-JAX reference mirroring the kernel's mixed-precision choices
    # (bf16 adjacency, bf16 intermediate features, f32 accumulation).
    hi = jax.lax.Precision.HIGHEST
    adj_ref = model.adj.astype(jnp.float32)
    ref = x
    for idx, (w, b) in enumerate(zip(model.weights, model.biases)):
        t = jnp.matmul(ref, w, precision=hi)
        t = t.astype(jnp.bfloat16).astype(jnp.float32)
        ref = jnp.matmul(adj_ref, t, precision=hi) + b
        if idx < len(model.weights) - 1:
            ref = jnp.maximum(ref, 0.0)

    assert out.shape == (num_nodes, out_channels)
    # Tolerance accounts for bf16 rounding of the intermediate features.
    err = float(jnp.max(jnp.abs(out - ref)))
    assert jnp.allclose(out, ref, atol=1e-2, rtol=1e-2), err

    print("KERNEL_OK")
</pallas_src>

<mosaic_0001>
module attributes {stable_mosaic.version = 11 : i64} {
  func.func @_matmul_bias_kernel(%arg0: i32, %arg1: i32, %arg2: i32, %arg3: memref<256x128xf32, #tpu.memory_space<vmem>>, %arg4: memref<128x128xf32, #tpu.memory_space<vmem>>, %arg5: memref<1x128xf32, #tpu.memory_space<vmem>>, %arg6: memref<256x128xbf16, #tpu.memory_space<vmem>>, %arg7: memref<256x128xf32, #tpu.memory_space<vmem>>) attributes {dimension_semantics = [#tpu.dimension_semantics<parallel>, #tpu.dimension_semantics<parallel>, #tpu.dimension_semantics<arbitrary>], iteration_bounds = array<i64: 1, 1, 1>, scalar_prefetch = 0 : i64, scratch_operands = 1 : i64, tpu.core_type = #tpu.core_type<tc>, window_params = [{transform_indices = @transform_0, window_bounds = array<i64: 256, 128>}, {transform_indices = @transform_1, window_bounds = array<i64: 128, 128>}, {transform_indices = @transform_2, window_bounds = array<i64: 1, 128>}, {transform_indices = @transform_3, window_bounds = array<i64: 256, 128>}]} {
    %c0_i32 = arith.constant 0 : i32
    %0 = arith.cmpi eq, %arg2, %c0_i32 : i32
    %1 = arith.extui %0 : i1 to i32
    %c0_i32_0 = arith.constant 0 : i32
    %2 = arith.cmpi ne, %1, %c0_i32_0 : i32
    scf.if %2 {
      %cst_10 = arith.constant 0.000000e+00 : f32
      %12 = vector.broadcast %cst_10 : f32 to vector<256x128xf32>
      %c0_11 = arith.constant 0 : index
      %c0_12 = arith.constant 0 : index
      %13 = vector.load %arg7[%c0_11, %c0_12] : memref<256x128xf32, #tpu.memory_space<vmem>>, vector<256x128xf32>
      tpu.vector_store %arg7[%c0_11, %c0_12], %12 {strides = array<i32>} : memref<256x128xf32, #tpu.memory_space<vmem>>, vector<256x128xf32>,
    } else {
    }
    %c0 = arith.constant 0 : index
    %c0_1 = arith.constant 0 : index
    %3 = vector.load %arg7[%c0, %c0_1] : memref<256x128xf32, #tpu.memory_space<vmem>>, vector<256x128xf32>
    %c0_2 = arith.constant 0 : index
    %c0_3 = arith.constant 0 : index
    %4 = vector.load %arg3[%c0_2, %c0_3] : memref<256x128xf32, #tpu.memory_space<vmem>>, vector<256x128xf32>
    %c0_4 = arith.constant 0 : index
    %c0_5 = arith.constant 0 : index
    %5 = vector.load %arg4[%c0_4, %c0_5] : memref<128x128xf32, #tpu.memory_space<vmem>>, vector<128x128xf32>
    %cst = arith.constant dense<0.000000e+00> : vector<256x128xf32>
    %6 = tpu.matmul %4, %5, %cst {dimension_numbers = #tpu.dot_dimension_numbers<[1], [0], [0], [1], [0, 0, 1, 1], [], []>} : vector<256x128xf32>, vector<128x128xf32>, vector<256x128xf32> -> vector<256x128xf32>
    %7 = arith.addf %3, %6 : vector<256x128xf32>
    %c0_6 = arith.constant 0 : index
    %c0_7 = arith.constant 0 : index
    %8 = vector.load %arg7[%c0_6, %c0_7] : memref<256x128xf32, #tpu.memory_space<vmem>>, vector<256x128xf32>
    tpu.vector_store %arg7[%c0_6, %c0_7], %7 {strides = array<i32>} : memref<256x128xf32, #tpu.memory_space<vmem>>, vector<256x128xf32>,
    %c0_i32_8 = arith.constant 0 : i32
    %9 = arith.cmpi eq, %arg2, %c0_i32_8 : i32
    %10 = arith.extui %9 : i1 to i32
    %c0_i32_9 = arith.constant 0 : i32
    %11 = arith.cmpi ne, %10, %c0_i32_9 : i32
    scf.if %11 {
      %c0_10 = arith.constant 0 : index
      %c0_11 = arith.constant 0 : index
      %12 = vector.load %arg7[%c0_10, %c0_11] : memref<256x128xf32, #tpu.memory_space<vmem>>, vector<256x128xf32>
      %c0_12 = arith.constant 0 : index
      %c0_13 = arith.constant 0 : index
      %13 = vector.load %arg5[%c0_12, %c0_13] : memref<1x128xf32, #tpu.memory_space<vmem>>, vector<1x128xf32>
      %14 = vector.broadcast %13 : vector<1x128xf32> to vector<256x128xf32>
      %15 = arith.addf %12, %14 : vector<256x128xf32>
      %16 = arith.truncf %15 : vector<256x128xf32> to vector<256x128xbf16>
      %c0_14 = arith.constant 0 : index
      %c0_15 = arith.constant 0 : index
      %17 = vector.load %arg6[%c0_14, %c0_15] : memref<256x128xbf16, #tpu.memory_space<vmem>>, vector<256x128xbf16>
      tpu.vector_store %arg6[%c0_14, %c0_15], %16 {strides = array<i32>} : memref<256x128xbf16, #tpu.memory_space<vmem>>, vector<256x128xbf16>,
    } else {
    }
    return
  }
  func.func @transform_0(%arg0: i32, %arg1: i32, %arg2: i32) -> (i32, i32) {
    %c0_i32 = arith.constant 0 : i32
    return %arg0, %arg2 : i32, i32
  }
  func.func @transform_1(%arg0: i32, %arg1: i32, %arg2: i32) -> (i32, i32) {
    %c0_i32 = arith.constant 0 : i32
    return %arg2, %arg1 : i32, i32
  }
  func.func @transform_2(%arg0: i32, %arg1: i32, %arg2: i32) -> (i32, i32) {
    %c0_i32 = arith.constant 0 : i32
    %c0_i32_0 = arith.constant 0 : i32
    return %c0_i32, %arg1 : i32, i32
  }
  func.func @transform_3(%arg0: i32, %arg1: i32, %arg2: i32) -> (i32, i32) {
    %c0_i32 = arith.constant 0 : i32
    return %arg0, %arg1 : i32, i32
  }
}

</mosaic_0001>

<bundles_post_ra>
// kernel: matmul_bias.1
= control target key start
LH: loop header
LB: loop body
LE: loop exit
PB: predicated region body
PF: predicated region fallthrough
CT: control target
= control target key end

     0   :  { %8 = vsyncpa [#allocation4], 0  ;;  %s797_s0 = inlined_call_operand.hbm [shape: f32[256,128], index: 0, kind: input, shape index: {}]   ;;  %s798_s1 = inlined_call_operand.hbm [shape: f32[128,128], index: 1, kind: input, shape index: {}]   ;;  %s799_s2 = inlined_call_operand.vmem [shape: f32[1,128], index: 2, kind: input, shape index: {}]   ;;  %s800_s3 = inlined_call_operand.hbm [shape: bf16[256,128], index: 3, kind: output, shape index: {}]  }
   0x1   :  { %9 = vsyncpa [#allocation7], 0 }
   0x2   :  { %10 = vsyncpa [#allocation5], 0  ;;  %s15_s14 = sshll.u32 %s797_s0, 4  ;;  %s724_s15 = smov [#allocation3]   ;;  %s16_s14 = int_to_ptr.hbm [resolvable:$true] %s15_s14 }
   0x3   :  { %s17_s16 = sshll.u32 %s724_s15, 4  ;;  %s28_s19 = sshll.u32 %s798_s1, 4  ;;  %s18_s16 = int_to_ptr.vmem [resolvable:$true] %s17_s16  ;;  %s29_s19 = int_to_ptr.hbm [resolvable:$true] %s28_s19 }
   0x4   :  { %s725_s20 = smov 128   ;;  %s726_s21 = smov 8  }
   0x5   :  { %23 = dma.hbm_to_vmem [thread:$0]  %s16_s14, 4096, %s18_s16, [#allocation4], %s725_s20, %s725_s20, %s726_s21  }
   0x6   :  { %s727_s22 = smov [#allocation6]  }
   0x7   :  { %s30_s23 = sshll.u32 %s727_s22, 4  ;;  %s31_s23 = int_to_ptr.vmem [resolvable:$true] %s30_s23 }
   0x8   :  { %36 = dma.hbm_to_vmem [thread:$0]  %s29_s19, 2048, %s31_s23, [#allocation7], %s725_s20, %s725_s20, %s726_s21  }
   0x9   :  { %718 = dma.done.wait [#allocation4], 4096  }
   0xa   :  { %719 = vsyncadd [#allocation4], 4294963200 }
   0xb   :  { %720 = dma.done.wait [#allocation7], 2048  }
   0xc   :  { %721 = vsyncadd [#allocation7], 4294965248  ;;  %v162_v0 = vld [vmem:[#allocation6 + $0x78] sm:$0xff]  ;;  %v161_v1 = vld [vmem:[#allocation6 + $0x70] sm:$0xff]  ;;  %s481_s27 = sshll.u32 %s800_s3, 4  ;;  %s729_s28 = smov 64   ;;  %s482_s27 = int_to_ptr.hbm [resolvable:$true] %s481_s27 }
   0xd   :  { %163 = vmatpush.msra.mxu0 %v162_v0  ;;  %590 = vmatpush.msra.mxu1 %v162_v0  ;;  %v160_v2 = vld [vmem:[#allocation6 + $0x68] sm:$0xff]  ;;  %v159_v3 = vld [vmem:[#allocation6 + $0x60] sm:$0xff]  ;;  %v158_v4 = vld [vmem:[#allocation6 + $0x58] sm:$0xff]  ;;  %s730_s29 = smov 4  }
   0xe   :  { %591 = vmatpush.msra.mxu2 %v162_v0  ;;  %592 = vmatpush.msra.mxu3 %v162_v0  ;;  %v157_v5 = vld [vmem:[#allocation6 + $0x50] sm:$0xff]  ;;  %v156_v6 = vld [vmem:[#allocation6 + $0x48] sm:$0xff]  ;;  %v155_v7 = vld [vmem:[#allocation6 + $0x40] sm:$0xff] }
   0xf   :  { %164 = vmatpush.msra.mxu0 %v161_v1  ;;  %593 = vmatpush.msra.mxu1 %v161_v1  ;;  %v154_v8 = vld [vmem:[#allocation6 + $0x38] sm:$0xff]  ;;  %v153_v9 = vld [vmem:[#allocation6 + $0x30] sm:$0xff]  ;;  %v152_v10 = vld [vmem:[#allocation6 + $0x28] sm:$0xff] }
  0x10   :  { %594 = vmatpush.msra.mxu2 %v161_v1  ;;  %595 = vmatpush.msra.mxu3 %v161_v1  ;;  %v151_v11 = vld [vmem:[#allocation6 + $0x20] sm:$0xff]  ;;  %v150_v12 = vld [vmem:[#allocation6 + $0x18] sm:$0xff]  ;;  %v149_v13 = vld [vmem:[#allocation6 + $0x10] sm:$0xff] }
  0x11   :  { %165 = vmatpush.msra.mxu0 %v160_v2  ;;  %596 = vmatpush.msra.mxu1 %v160_v2  ;;  %v148_v14 = vld [vmem:[#allocation6 + $0x8] sm:$0xff]  ;;  %v147_v15 = vld [vmem:[#allocation6] sm:$0xff]  ;;  %v117_v24 = vld [vmem:[#allocation3 + $0x10] sm:$0xff] }
  0x12   :  { %597 = vmatpush.msra.mxu2 %v160_v2  ;;  %598 = vmatpush.msra.mxu3 %v160_v2  ;;  %v115_v16 = vld [vmem:[#allocation3] sm:$0xff]  ;;  %v116_v20 = vld [vmem:[#allocation3 + $0x8] sm:$0xff]  ;;  %v125_v25 = vld [vmem:[#allocation3 + $0x50] sm:$0xff] }
  0x13   :  { %166 = vmatpush.msra.mxu0 %v159_v3  ;;  %599 = vmatpush.msra.mxu1 %v159_v3  ;;  %v123_v17 = vld [vmem:[#allocation3 + $0x40] sm:$0xff]  ;;  %v124_v21 = vld [vmem:[#allocation3 + $0x48] sm:$0xff]  ;;  %v133_v26 = vld [vmem:[#allocation3 + $0x90] sm:$0xff] }
  0x14   :  { %600 = vmatpush.msra.mxu2 %v159_v3  ;;  %601 = vmatpush.msra.mxu3 %v159_v3  ;;  %v131_v18 = vld [vmem:[#allocation3 + $0x80] sm:$0xff]  ;;  %v132_v22 = vld [vmem:[#allocation3 + $0x88] sm:$0xff]  ;;  %v141_v27 = vld [vmem:[#allocation3 + $0xd0] sm:$0xff] }
  0x15   :  { %167 = vmatpush.msra.mxu0 %v158_v4  ;;  %602 = vmatpush.msra.mxu1 %v158_v4  ;;  %v139_v19 = vld [vmem:[#allocation3 + $0xc0] sm:$0xff]  ;;  %v140_v23 = vld [vmem:[#allocation3 + $0xc8] sm:$0xff]  ;;  %v118_v28 = vld [vmem:[#allocation3 + $0x18] sm:$0xff] }
  0x16   :  { %603 = vmatpush.msra.mxu2 %v158_v4  ;;  %604 = vmatpush.msra.mxu3 %v158_v4  ;;  %v126_v29 = vld [vmem:[#allocation3 + $0x58] sm:$0xff]  ;;  %v119_v32 = vld [vmem:[#allocation3 + $0x20] sm:$0xff]  ;;  %v120_v36 = vld [vmem:[#allocation3 + $0x28] sm:$0xff] }
  0x17   :  { %168 = vmatpush.msra.mxu0 %v157_v5  ;;  %605 = vmatpush.msra.mxu1 %v157_v5  ;;  %v134_v30 = vld [vmem:[#allocation3 + $0x98] sm:$0xff]  ;;  %v127_v33 = vld [vmem:[#allocation3 + $0x60] sm:$0xff]  ;;  %v128_v37 = vld [vmem:[#allocation3 + $0x68] sm:$0xff] }
  0x18   :  { %606 = vmatpush.msra.mxu2 %v157_v5  ;;  %607 = vmatpush.msra.mxu3 %v157_v5  ;;  %v142_v31 = vld [vmem:[#allocation3 + $0xd8] sm:$0xff]  ;;  %v135_v34 = vld [vmem:[#allocation3 + $0xa0] sm:$0xff]  ;;  %v136_v38 = vld [vmem:[#allocation3 + $0xa8] sm:$0xff] }
  0x19   :  { %169 = vmatpush.msra.mxu0 %v156_v6  ;;  %608 = vmatpush.msra.mxu1 %v156_v6  ;;  %v143_v35 = vld [vmem:[#allocation3 + $0xe0] sm:$0xff]  ;;  %v144_v39 = vld [vmem:[#allocation3 + $0xe8] sm:$0xff]  ;;  %v121_v40 = vld [vmem:[#allocation3 + $0x30] sm:$0xff] }
  0x1a   :  { %609 = vmatpush.msra.mxu2 %v156_v6  ;;  %610 = vmatpush.msra.mxu3 %v156_v6  ;;  %v129_v41 = vld [vmem:[#allocation3 + $0x70] sm:$0xff]  ;;  %v122_v44 = vld [vmem:[#allocation3 + $0x38] sm:$0xff]  ;;  %v760_v50 = vld [vmem:[%s799_s2] ss:$0 sm:$0xff]  ;;  %s728_s2 = smov [#allocation8]  }
  0x1b   :  { %170 = vmatpush.msra.mxu0 %v155_v7  ;;  %611 = vmatpush.msra.mxu1 %v155_v7  ;;  %v137_v42 = vld [vmem:[#allocation3 + $0xb0] sm:$0xff]  ;;  %v130_v45 = vld [vmem:[#allocation3 + $0x78] sm:$0xff]  ;;  %s479_s24 = sshll.u32 %s728_s2, 4  ;;  %s480_s24 = int_to_ptr.vmem [resolvable:$true] %s479_s24 }
  0x1c   :  { %612 = vmatpush.msra.mxu2 %v155_v7  ;;  %613 = vmatpush.msra.mxu3 %v155_v7  ;;  %v145_v43 = vld [vmem:[#allocation3 + $0xf0] sm:$0xff]  ;;  %v138_v46 = vld [vmem:[#allocation3 + $0xb8] sm:$0xff] }
  0x1d   :  { %171 = vmatpush.msra.mxu0 %v154_v8  ;;  %614 = vmatpush.msra.mxu1 %v154_v8  ;;  %v146_v47 = vld [vmem:[#allocation3 + $0xf8] sm:$0xff] }
  0x1e   :  { %615 = vmatpush.msra.mxu2 %v154_v8  ;;  %616 = vmatpush.msra.mxu3 %v154_v8 }
  0x1f   :  { %172 = vmatpush.msra.mxu0 %v153_v9  ;;  %617 = vmatpush.msra.mxu1 %v153_v9 }
  0x20   :  { %618 = vmatpush.msra.mxu2 %v153_v9  ;;  %619 = vmatpush.msra.mxu3 %v153_v9 }
  0x21   :  { %173 = vmatpush.msra.mxu0 %v152_v10  ;;  %620 = vmatpush.msra.mxu1 %v152_v10 }
  0x22   :  { %621 = vmatpush.msra.mxu2 %v152_v10  ;;  %622 = vmatpush.msra.mxu3 %v152_v10 }
  0x23   :  { %174 = vmatpush.msra.mxu0 %v151_v11  ;;  %623 = vmatpush.msra.mxu1 %v151_v11 }
  0x24   :  { %624 = vmatpush.msra.mxu2 %v151_v11  ;;  %625 = vmatpush.msra.mxu3 %v151_v11 }
  0x25   :  { %175 = vmatpush.msra.mxu0 %v150_v12  ;;  %626 = vmatpush.msra.mxu1 %v150_v12 }
  0x26   :  { %627 = vmatpush.msra.mxu2 %v150_v12  ;;  %628 = vmatpush.msra.mxu3 %v150_v12 }
  0x27   :  { %176 = vmatpush.msra.mxu0 %v149_v13  ;;  %629 = vmatpush.msra.mxu1 %v149_v13 }
  0x28   :  { %630 = vmatpush.msra.mxu2 %v149_v13  ;;  %631 = vmatpush.msra.mxu3 %v149_v13 }
  0x29   :  { %177 = vmatpush.msra.mxu0 %v148_v14  ;;  %632 = vmatpush.msra.mxu1 %v148_v14 }
  0x2a   :  { %633 = vmatpush.msra.mxu2 %v148_v14  ;;  %634 = vmatpush.msra.mxu3 %v148_v14 }
  0x2b   :  { %178 = vmatpush.msra.mxu0 %v147_v15  ;;  %635 = vmatpush.msra.mxu1 %v147_v15 }
  0x2c   :  { %636 = vmatpush.msra.mxu2 %v147_v15  ;;  %637 = vmatpush.msra.mxu3 %v147_v15 }
  0x2d   :  { %179 = vmatmul.f32.vlgmr.msra.gmra.mxu0 %v115_v16  ;;  %203 = vmatmul.f32.vlgmr.msra.gmra.mxu1 %v123_v17 }
  0x2e   :  { %227 = vmatmul.f32.vlgmr.msra.gmra.mxu2 %v131_v18  ;;  %251 = vmatmul.f32.vlgmr.msra.gmra.mxu3 %v139_v19 }
  0x35   :  { %182 = vmatmul.f32.gmra.mxu0 %v116_v20  ;;  %206 = vmatmul.f32.gmra.mxu1 %v124_v21 }
  0x36   :  { %230 = vmatmul.f32.gmra.mxu2 %v132_v22  ;;  %254 = vmatmul.f32.gmra.mxu3 %v140_v23 }
  0x3d   :  { %185 = vmatmul.f32.gmra.mxu0 %v117_v24  ;;  %209 = vmatmul.f32.gmra.mxu1 %v125_v25 }
  0x3e   :  { %233 = vmatmul.f32.gmra.mxu2 %v133_v26  ;;  %257 = vmatmul.f32.gmra.mxu3 %v141_v27 }
  0x45   :  { %188 = vmatmul.f32.gmra.mxu0 %v118_v28  ;;  %212 = vmatmul.f32.gmra.mxu1 %v126_v29 }
  0x46   :  { %236 = vmatmul.f32.gmra.mxu2 %v134_v30  ;;  %260 = vmatmul.f32.gmra.mxu3 %v142_v31 }
  0x4d   :  { %191 = vmatmul.f32.gmra.mxu0 %v119_v32  ;;  %215 = vmatmul.f32.gmra.mxu1 %v127_v33 }
  0x4e   :  { %239 = vmatmul.f32.gmra.mxu2 %v135_v34  ;;  %263 = vmatmul.f32.gmra.mxu3 %v143_v35 }
  0x55   :  { %194 = vmatmul.f32.gmra.mxu0 %v120_v36  ;;  %218 = vmatmul.f32.gmra.mxu1 %v128_v37 }
  0x56   :  { %242 = vmatmul.f32.gmra.mxu2 %v136_v38  ;;  %266 = vmatmul.f32.gmra.mxu3 %v144_v39 }
  0x5d   :  { %197 = vmatmul.f32.gmra.mxu0 %v121_v40  ;;  %221 = vmatmul.f32.gmra.mxu1 %v129_v41 }
  0x5e   :  { %245 = vmatmul.f32.gmra.mxu2 %v137_v42  ;;  %269 = vmatmul.f32.gmra.mxu3 %v145_v43 }
  0x65   :  { %200 = vmatmul.f32.gmra.mxu0 %v122_v44  ;;  %224 = vmatmul.f32.gmra.mxu1 %v130_v45 }
  0x66   :  { %248 = vmatmul.f32.gmra.mxu2 %v138_v46  ;;  %272 = vmatmul.f32.gmra.mxu3 %v146_v47 }
  0xaa   :  { %v180_v48 = vpop.f32.mrf.mxu0  ;;  %v204_v49 = vpop.f32.mrf.mxu1 }
  0xab   :  { %v379_v55 = vadd.f32 %v760_v50, %v180_v48  ;;  %v387_v56 = vadd.f32 %v760_v50, %v204_v49 }
  0xb1   :  { %v228_v51 = vpop.f32.mrf.mxu2  ;;  %v252_v52 = vpop.f32.mrf.mxu3 }
  0xb2   :  { %v183_v53 = vpop.f32.mrf.mxu0  ;;  %v207_v54 = vpop.f32.mrf.mxu1  ;;  %v395_v63 = vadd.f32 %v760_v50, %v228_v51  ;;  %v403_v0 = vadd.f32 %v760_v50, %v252_v52 }
  0xb3   :  { %v380_v57 = vadd.f32 %v760_v50, %v183_v53  ;;  %v388_v58 = vadd.f32 %v760_v50, %v207_v54 }
  0xb5   :  { %v498_v59 = vpack.c.bf16 %v380_v57, %v379_v55  ;;  %v518_v60 = vpack.c.bf16 %v388_v58, %v387_v56 }
  0xb7   :  { %499 = vst [vmem:[#allocation8] sm:$0xff] %v498_v59  }
  0xb8   :  { %578 = vst [vmem:[#allocation8 + $0x20] sm:$0xff] %v518_v60  }
  0xb9   :  { %v231_v61 = vpop.f32.mrf.mxu2  ;;  %v255_v62 = vpop.f32.mrf.mxu3 }
  0xba   :  { %v396_v1 = vadd.f32 %v760_v50, %v231_v61  ;;  %v404_v2 = vadd.f32 %v760_v50, %v255_v62  ;;  %v186_v3 = vpop.f32.mrf.mxu0  ;;  %v210_v4 = vpop.f32.mrf.mxu1 }
  0xbb   :  { %v381_v11 = vadd.f32 %v760_v50, %v186_v3  ;;  %v389_v12 = vadd.f32 %v760_v50, %v210_v4 }
  0xbc   :  { %v538_v5 = vpack.c.bf16 %v396_v1, %v395_v63  ;;  %v558_v6 = vpack.c.bf16 %v404_v2, %v403_v0 }
  0xbe   :  { %582 = vst [vmem:[#allocation8 + $0x40] sm:$0xff] %v538_v5  }
  0xbf   :  { %586 = vst [vmem:[#allocation8 + $0x60] sm:$0xff] %v558_v6  }
  0xc1   :  { %v234_v7 = vpop.f32.mrf.mxu2  ;;  %v258_v8 = vpop.f32.mrf.mxu3 }
  0xc2   :  { %v189_v9 = vpop.f32.mrf.mxu0  ;;  %v213_v10 = vpop.f32.mrf.mxu1  ;;  %v397_v19 = vadd.f32 %v760_v50, %v234_v7  ;;  %v405_v20 = vadd.f32 %v760_v50, %v258_v8 }
  0xc3   :  { %v382_v13 = vadd.f32 %v760_v50, %v189_v9  ;;  %v390_v14 = vadd.f32 %v760_v50, %v213_v10 }
  0xc5   :  { %v503_v15 = vpack.c.bf16 %v382_v13, %v381_v11  ;;  %v523_v16 = vpack.c.bf16 %v390_v14, %v389_v12 }
  0xc7   :  { %575 = vst [vmem:[#allocation8 + $0x8] sm:$0xff] %v503_v15  }
  0xc8   :  { %579 = vst [vmem:[#allocation8 + $0x28] sm:$0xff] %v523_v16  }
  0xc9   :  { %v237_v17 = vpop.f32.mrf.mxu2  ;;  %v261_v18 = vpop.f32.mrf.mxu3 }
  0xca   :  { %v398_v21 = vadd.f32 %v760_v50, %v237_v17  ;;  %v406_v22 = vadd.f32 %v760_v50, %v261_v18  ;;  %v192_v23 = vpop.f32.mrf.mxu0  ;;  %v216_v24 = vpop.f32.mrf.mxu1 }
  0xcb   :  { %v383_v31 = vadd.f32 %v760_v50, %v192_v23  ;;  %v391_v32 = vadd.f32 %v760_v50, %v216_v24 }
  0xcc   :  { %v543_v25 = vpack.c.bf16 %v398_v21, %v397_v19  ;;  %v563_v26 = vpack.c.bf16 %v406_v22, %v405_v20 }
  0xce   :  { %583 = vst [vmem:[#allocation8 + $0x48] sm:$0xff] %v543_v25  }
  0xcf   :  { %587 = vst [vmem:[#allocation8 + $0x68] sm:$0xff] %v563_v26  }
  0xd1   :  { %v240_v27 = vpop.f32.mrf.mxu2  ;;  %v264_v28 = vpop.f32.mrf.mxu3 }
  0xd2   :  { %v195_v29 = vpop.f32.mrf.mxu0  ;;  %v219_v30 = vpop.f32.mrf.mxu1  ;;  %v399_v39 = vadd.f32 %v760_v50, %v240_v27  ;;  %v407_v40 = vadd.f32 %v760_v50, %v264_v28 }
  0xd3   :  { %v384_v33 = vadd.f32 %v760_v50, %v195_v29  ;;  %v392_v34 = vadd.f32 %v760_v50, %v219_v30 }
  0xd5   :  { %v508_v35 = vpack.c.bf16 %v384_v33, %v383_v31  ;;  %v528_v36 = vpack.c.bf16 %v392_v34, %v391_v32 }
  0xd7   :  { %576 = vst [vmem:[#allocation8 + $0x10] sm:$0xff] %v508_v35  }
  0xd8   :  { %580 = vst [vmem:[#allocation8 + $0x30] sm:$0xff] %v528_v36  }
  0xd9   :  { %v243_v37 = vpop.f32.mrf.mxu2  ;;  %v267_v38 = vpop.f32.mrf.mxu3 }
  0xda   :  { %v400_v41 = vadd.f32 %v760_v50, %v243_v37  ;;  %v408_v42 = vadd.f32 %v760_v50, %v267_v38  ;;  %v198_v43 = vpop.f32.mrf.mxu0  ;;  %v222_v44 = vpop.f32.mrf.mxu1 }
  0xdb   :  { %v385_v52 = vadd.f32 %v760_v50, %v198_v43  ;;  %v393_v53 = vadd.f32 %v760_v50, %v222_v44 }
  0xdc   :  { %v548_v45 = vpack.c.bf16 %v400_v41, %v399_v39  ;;  %v568_v46 = vpack.c.bf16 %v408_v42, %v407_v40 }
  0xde   :  { %584 = vst [vmem:[#allocation8 + $0x50] sm:$0xff] %v548_v45  }
  0xdf   :  { %588 = vst [vmem:[#allocation8 + $0x70] sm:$0xff] %v568_v46  }
  0xe1   :  { %v246_v47 = vpop.f32.mrf.mxu2  ;;  %v270_v48 = vpop.f32.mrf.mxu3 }
  0xe2   :  { %v201_v49 = vpop.f32.mrf.mxu0  ;;  %v225_v51 = vpop.f32.mrf.mxu1  ;;  %v401_v60 = vadd.f32 %v760_v50, %v246_v47  ;;  %v409_v61 = vadd.f32 %v760_v50, %v270_v48 }
  0xe3   :  { %v386_v54 = vadd.f32 %v760_v50, %v201_v49  ;;  %v394_v55 = vadd.f32 %v760_v50, %v225_v51 }
  0xe5   :  { %v513_v56 = vpack.c.bf16 %v386_v54, %v385_v52  ;;  %v533_v57 = vpack.c.bf16 %v394_v55, %v393_v53 }
  0xe7   :  { %577 = vst [vmem:[#allocation8 + $0x18] sm:$0xff] %v513_v56  }
  0xe8   :  { %581 = vst [vmem:[#allocation8 + $0x38] sm:$0xff] %v533_v57  }
  0xe9   :  { %v249_v58 = vpop.f32.mrf.mxu2  ;;  %v273_v59 = vpop.f32.mrf.mxu3 }
  0xea   :  { %v402_v62 = vadd.f32 %v760_v50, %v249_v58  ;;  %v410_v63 = vadd.f32 %v760_v50, %v273_v59 }
  0xec   :  { %v553_v0 = vpack.c.bf16 %v402_v62, %v401_v60  ;;  %v573_v1 = vpack.c.bf16 %v410_v63, %v409_v61 }
  0xee   :  { %585 = vst [vmem:[#allocation8 + $0x58] sm:$0xff] %v553_v0  }
  0xef   :  { %589 = vst [vmem:[#allocation8 + $0x78] sm:$0xff] %v573_v1  }
  0xf0   :  { %487 = dma.vmem_to_hbm [thread:$0]  %s480_s24, 2048, %s482_s27, [#allocation5], %s729_s28, %s729_s28, %s730_s29  }
  0xf1   :  { %722 = dma.done.wait [#allocation5], 2048  }
  0xf2   :  { %723 = vsyncadd [#allocation5], 4294965248 }
  0xf3   :  { %492 = vsyncpa [#allocation4], 1 }
  0xf4   :  { %493 = vsyncpa [#allocation7], 1 }
  0xf5   :  { %494 = vsyncpa [#allocation5], 1 }

</bundles_post_ra>
